<compile_context>
chip_gen: v5e
topology: v5e:2x2
jax: 0.10.0
libtpu: 0.0.40
codegen_flags: <defaults>
</compile_context>

<pallas_src>
import jax
import jax.numpy as jnp
from jax import lax
from jax.experimental import pallas as pl
from jax.experimental.pallas import tpu as pltpu


def _round_up(x, m):
    return (x + m - 1) // m * m


def _make_softmax_emb_kernel(valid_v):
    """out = softmax(x @ W.T over the first `valid_v` vocab cols) @ W, one row tile."""

    def kernel(x_ref, w_ref, o_ref):
        x = x_ref[...]                           # (TN, Dp) f32
        w = w_ref[...]                           # (Vp, Dp) f32, resident across grid
        xb = x.astype(jnp.bfloat16)
        wb = w.astype(jnp.bfloat16)

        # scores[n, v] = sum_d x[n, d] * w[v, d]
        # Contraction over D expressed directly (rhs contracting dim = 1), so the
        # MXU is fed without materializing a transposed copy of W on the XLU.
        scores = lax.dot_general(
            xb, wb,
            dimension_numbers=(((1,), (1,)), ((), ())),
            preferred_element_type=jnp.float32)  # (TN, Vp) f32

        # Mask padded vocab columns so they vanish under the softmax.
        if valid_v < scores.shape[-1]:
            col = lax.broadcasted_iota(jnp.int32, scores.shape, 1)
            scores = jnp.where(col < valid_v, scores, -jnp.inf)

        # Numerically-stable softmax along the vocab axis, all f32 (VPU/EUP).
        m = jnp.max(scores, axis=-1, keepdims=True)
        e = jnp.exp(scores - m)
        denom = jnp.sum(e, axis=-1, keepdims=True)
        probs = e * pl.reciprocal(denom, approx=True)   # EUP vrcp slot

        # Project back to embedding space (padded W rows are zero, contribute 0).
        out = jnp.dot(probs.astype(jnp.bfloat16), wb,
                      preferred_element_type=jnp.float32)  # (TN, Dp) f32
        o_ref[...] = out.astype(o_ref.dtype)

    return kernel


def _softmax_emb(x2d, w, *, row_tile=256):
    """x2d: (N, D), w: (V, D) -> (N, D) = softmax(x2d @ w.T) @ w."""
    N, D = x2d.shape
    V, Dw = w.shape
    assert D == Dw

    # Lane-dense layout: pad last dims of x/W/scores/out to multiples of 128.
    Dp = _round_up(D, 128)
    Vp = _round_up(V, 128)
    # Row tile: multiple of 8 (sublane), modest so the (TN, Vp) scores tile and
    # double-buffered row tiles fit comfortably even in v7x's 64 MiB VMEM.
    TN = min(row_tile, _round_up(N, 8))
    Np = _round_up(N, TN)

    xp = jnp.pad(x2d, ((0, Np - N), (0, Dp - D)))
    wp = jnp.pad(w, ((0, Vp - V), (0, Dp - D)))

    grid = (Np // TN,)

    # Rough VMEM budget: double-buffered x/out tiles + resident W + scores temps.
    est = 4 * (2 * TN * Dp * 2 + 2 * Vp * Dp + 3 * TN * Vp)
    vmem_limit = int(min(64 * 1024 * 1024, max(32 * 1024 * 1024, 2 * est)))

    cost = pl.CostEstimate(
        flops=4 * Np * Vp * Dp,          # two (N,V,D) matmuls, 2 flops/MAC
        transcendentals=Np * Vp,         # exp
        bytes_accessed=4 * (2 * Np * Dp + Vp * Dp),
    )

    out = pl.pallas_call(
        _make_softmax_emb_kernel(V),
        out_shape=jax.ShapeDtypeStruct((Np, Dp), x2d.dtype),
        grid=grid,
        in_specs=[
            pl.BlockSpec((TN, Dp), lambda i: (i, 0)),   # row tile of x
            pl.BlockSpec((Vp, Dp), lambda i: (0, 0)),   # W resident across rows
        ],
        out_specs=pl.BlockSpec((TN, Dp), lambda i: (i, 0)),
        compiler_params=pltpu.CompilerParams(
            dimension_semantics=("parallel",),          # shard rows across TCs (v7x)
            vmem_limit_bytes=vmem_limit,
        ),
        cost_estimate=cost,
    )(xp, wp)
    return out[:N, :D]


# TODO(synk): fuse the G and T branches into a single pallas_call when their
# padded (V, D) layouts match; for now both run under one jit so XLA overlaps them.
@jax.jit
def self_attention_forward(input_G, input_T, mask, W_G_emb, W_T_emb):
    """Mirrors SelfAttention.forward; `mask` is accepted but unused (as in PyTorch)."""
    del mask
    Bg, Sg, Dg = input_G.shape
    Bt, St, Dt = input_T.shape
    g_res = _softmax_emb(input_G.reshape(Bg * Sg, Dg), W_G_emb).reshape(Bg, Sg, Dg)
    t_res = _softmax_emb(input_T.reshape(Bt * St, Dt), W_T_emb).reshape(Bt, St, Dt)
    return g_res, t_res


if __name__ == "__main__":
    key = jax.random.PRNGKey(0)
    k1, k2, k3, k4 = jax.random.split(key, 4)

    B, S = 2, 8
    Dg, Dt = 32, 32
    Vg, Vt = 64, 48

    W_G_emb = jax.random.normal(k1, (Vg, Dg), dtype=jnp.float32)
    W_T_emb = jax.random.normal(k2, (Vt, Dt), dtype=jnp.float32)
    input_G = jax.random.normal(k3, (B, S, Dg), dtype=jnp.float32)
    input_T = jax.random.normal(k4, (B, S, Dt), dtype=jnp.float32)
    mask = jnp.ones((B, S), dtype=jnp.float32)  # unused, as in the reference

    g_res, t_res = self_attention_forward(input_G, input_T, mask, W_G_emb, W_T_emb)
    jax.block_until_ready((g_res, t_res))

    # Reference that mirrors the kernel's numerics (bf16 MXU operands, f32 accum).
    def ref_bf16(x, w):
        xb = x.astype(jnp.bfloat16)
        wb = w.astype(jnp.bfloat16)
        s = jnp.einsum("bsd,vd->bsv", xb, wb, preferred_element_type=jnp.float32)
        p = jax.nn.softmax(s, axis=-1)
        return jnp.einsum("bsv,vd->bsd", p.astype(jnp.bfloat16), wb,
                          preferred_element_type=jnp.float32)

    # Exact f32 reference (module semantics), reported for information only.
    def ref_f32(x, w):
        s = jnp.einsum("bsd,vd->bsv", x, w)
        p = jax.nn.softmax(s, axis=-1)
        return jnp.einsum("bsv,vd->bsd", p, w)

    assert jnp.allclose(g_res, ref_bf16(input_G, W_G_emb), atol=2e-2, rtol=2e-2)
    assert jnp.allclose(t_res, ref_bf16(input_T, W_T_emb), atol=2e-2, rtol=2e-2)

    g_err = float(jnp.max(jnp.abs(g_res - ref_f32(input_G, W_G_emb))))
    t_err = float(jnp.max(jnp.abs(t_res - ref_f32(input_T, W_T_emb))))
    print(f"max abs diff vs f32 reference: G={g_err:.3e} T={t_err:.3e}")

    print("KERNEL_OK")
</pallas_src>

<mosaic_0001>
module attributes {stable_mosaic.version = 11 : i64} {
  func.func @kernel(%arg0: i32, %arg1: memref<16x128xf32, #tpu.memory_space<vmem>>, %arg2: memref<128x128xf32, #tpu.memory_space<vmem>>, %arg3: memref<16x128xf32, #tpu.memory_space<vmem>>) attributes {dimension_semantics = [#tpu.dimension_semantics<parallel>], iteration_bounds = array<i64: 1>, scalar_prefetch = 0 : i64, scratch_operands = 0 : i64, tpu.core_type = #tpu.core_type<tc>, window_params = [{transform_indices = @transform_0, window_bounds = array<i64: 16, 128>}, {pipeline_mode = #tpu.pipeline_mode<synchronous>, transform_indices = @transform_1, window_bounds = array<i64: 128, 128>}, {transform_indices = @transform_2, window_bounds = array<i64: 16, 128>}]} {
    %c0 = arith.constant 0 : index
    %c0_0 = arith.constant 0 : index
    %0 = vector.load %arg1[%c0, %c0_0] : memref<16x128xf32, #tpu.memory_space<vmem>>, vector<16x128xf32>
    %c0_1 = arith.constant 0 : index
    %c0_2 = arith.constant 0 : index
    %1 = vector.load %arg2[%c0_1, %c0_2] : memref<128x128xf32, #tpu.memory_space<vmem>>, vector<128x128xf32>
    %2 = arith.truncf %0 : vector<16x128xf32> to vector<16x128xbf16>
    %3 = arith.truncf %1 : vector<128x128xf32> to vector<128x128xbf16>
    %cst = arith.constant dense<0.000000e+00> : vector<16x128xf32>
    %4 = tpu.matmul %2, %3, %cst {dimension_numbers = #tpu.dot_dimension_numbers<[1], [1], [0], [0], [0, 0, 1, 0], [], []>} : vector<16x128xbf16>, vector<128x128xbf16>, vector<16x128xf32> -> vector<16x128xf32>
    %5 = tpu.iota {dimensions = array<i32: 1>} : vector<16x128xi32>
    %c64_i32 = arith.constant 64 : i32
    %6 = vector.broadcast %c64_i32 : i32 to vector<16x128xi32>
    %7 = arith.cmpi slt, %5, %6 : vector<16x128xi32>
    %cst_3 = arith.constant 0xFF800000 : f32
    %8 = vector.broadcast %cst_3 : f32 to vector<16x128xf32>
    %9 = arith.select %7, %4, %8 : vector<16x128xi1>, vector<16x128xf32>
    %cst_4 = arith.constant dense<0xFF800000> : vector<16xf32>
    %10 = vector.multi_reduction <maximumf>, %9, %cst_4 [1] : vector<16x128xf32> to vector<16xf32>
    %11 = vector.shape_cast %10 : vector<16xf32> to vector<16x1xf32>
    %12 = vector.broadcast %11 : vector<16x1xf32> to vector<16x128xf32>
    %13 = arith.subf %9, %12 : vector<16x128xf32>
    %14 = math.exp %13 : vector<16x128xf32>
    %cst_5 = arith.constant dense<0.000000e+00> : vector<16xf32>
    %15 = vector.multi_reduction <add>, %14, %cst_5 [1] : vector<16x128xf32> to vector<16xf32>
    %16 = vector.shape_cast %15 : vector<16xf32> to vector<16x1xf32>
    %17 = tpu.reciprocal %16 {approx = true} : vector<16x1xf32> -> vector<16x1xf32>
    %18 = vector.broadcast %17 : vector<16x1xf32> to vector<16x128xf32>
    %19 = arith.mulf %14, %18 : vector<16x128xf32>
    %20 = arith.truncf %19 : vector<16x128xf32> to vector<16x128xbf16>
    %cst_6 = arith.constant dense<0.000000e+00> : vector<16x128xf32>
    %21 = tpu.matmul %20, %3, %cst_6 {dimension_numbers = #tpu.dot_dimension_numbers<[1], [0], [0], [1], [0, 0, 1, 1], [], []>} : vector<16x128xbf16>, vector<128x128xbf16>, vector<16x128xf32> -> vector<16x128xf32>
    %c0_7 = arith.constant 0 : index
    %c0_8 = arith.constant 0 : index
    %22 = vector.load %arg3[%c0_7, %c0_8] : memref<16x128xf32, #tpu.memory_space<vmem>>, vector<16x128xf32>
    tpu.vector_store %arg3[%c0_7, %c0_8], %21 {strides = array<i32>} : memref<16x128xf32, #tpu.memory_space<vmem>>, vector<16x128xf32>,
    return
  }
  func.func @transform_0(%arg0: i32) -> (i32, i32) {
    %c0_i32 = arith.constant 0 : i32
    %c0_i32_0 = arith.constant 0 : i32
    return %arg0, %c0_i32 : i32, i32
  }
  func.func @transform_1(%arg0: i32) -> (i32, i32) {
    %c0_i32 = arith.constant 0 : i32
    %c0_i32_0 = arith.constant 0 : i32
    %c0_i32_1 = arith.constant 0 : i32
    return %c0_i32, %c0_i32_0 : i32, i32
  }
  func.func @transform_2(%arg0: i32) -> (i32, i32) {
    %c0_i32 = arith.constant 0 : i32
    %c0_i32_0 = arith.constant 0 : i32
    return %arg0, %c0_i32 : i32, i32
  }
}

module attributes {stable_mosaic.version = 11 : i64} {
  func.func @kernel(%arg0: i32, %arg1: memref<16x128xf32, #tpu.memory_space<vmem>>, %arg2: memref<128x128xf32, #tpu.memory_space<vmem>>, %arg3: memref<16x128xf32, #tpu.memory_space<vmem>>) attributes {dimension_semantics = [#tpu.dimension_semantics<parallel>], iteration_bounds = array<i64: 1>, scalar_prefetch = 0 : i64, scratch_operands = 0 : i64, tpu.core_type = #tpu.core_type<tc>, window_params = [{transform_indices = @transform_0, window_bounds = array<i64: 16, 128>}, {pipeline_mode = #tpu.pipeline_mode<synchronous>, transform_indices = @transform_1, window_bounds = array<i64: 128, 128>}, {transform_indices = @transform_2, window_bounds = array<i64: 16, 128>}]} {
    %c0 = arith.constant 0 : index
    %c0_0 = arith.constant 0 : index
    %0 = vector.load %arg1[%c0, %c0_0] : memref<16x128xf32, #tpu.memory_space<vmem>>, vector<16x128xf32>
    %c0_1 = arith.constant 0 : index
    %c0_2 = arith.constant 0 : index
    %1 = vector.load %arg2[%c0_1, %c0_2] : memref<128x128xf32, #tpu.memory_space<vmem>>, vector<128x128xf32>
    %2 = arith.truncf %0 : vector<16x128xf32> to vector<16x128xbf16>
    %3 = arith.truncf %1 : vector<128x128xf32> to vector<128x128xbf16>
    %cst = arith.constant dense<0.000000e+00> : vector<16x128xf32>
    %4 = tpu.matmul %2, %3, %cst {dimension_numbers = #tpu.dot_dimension_numbers<[1], [1], [0], [0], [0, 0, 1, 0], [], []>} : vector<16x128xbf16>, vector<128x128xbf16>, vector<16x128xf32> -> vector<16x128xf32>
    %5 = tpu.iota {dimensions = array<i32: 1>} : vector<16x128xi32>
    %c48_i32 = arith.constant 48 : i32
    %6 = vector.broadcast %c48_i32 : i32 to vector<16x128xi32>
    %7 = arith.cmpi slt, %5, %6 : vector<16x128xi32>
    %cst_3 = arith.constant 0xFF800000 : f32
    %8 = vector.broadcast %cst_3 : f32 to vector<16x128xf32>
    %9 = arith.select %7, %4, %8 : vector<16x128xi1>, vector<16x128xf32>
    %cst_4 = arith.constant dense<0xFF800000> : vector<16xf32>
    %10 = vector.multi_reduction <maximumf>, %9, %cst_4 [1] : vector<16x128xf32> to vector<16xf32>
    %11 = vector.shape_cast %10 : vector<16xf32> to vector<16x1xf32>
    %12 = vector.broadcast %11 : vector<16x1xf32> to vector<16x128xf32>
    %13 = arith.subf %9, %12 : vector<16x128xf32>
    %14 = math.exp %13 : vector<16x128xf32>
    %cst_5 = arith.constant dense<0.000000e+00> : vector<16xf32>
    %15 = vector.multi_reduction <add>, %14, %cst_5 [1] : vector<16x128xf32> to vector<16xf32>
    %16 = vector.shape_cast %15 : vector<16xf32> to vector<16x1xf32>
    %17 = tpu.reciprocal %16 {approx = true} : vector<16x1xf32> -> vector<16x1xf32>
    %18 = vector.broadcast %17 : vector<16x1xf32> to vector<16x128xf32>
    %19 = arith.mulf %14, %18 : vector<16x128xf32>
    %20 = arith.truncf %19 : vector<16x128xf32> to vector<16x128xbf16>
    %cst_6 = arith.constant dense<0.000000e+00> : vector<16x128xf32>
    %21 = tpu.matmul %20, %3, %cst_6 {dimension_numbers = #tpu.dot_dimension_numbers<[1], [0], [0], [1], [0, 0, 1, 1], [], []>} : vector<16x128xbf16>, vector<128x128xbf16>, vector<16x128xf32> -> vector<16x128xf32>
    %c0_7 = arith.constant 0 : index
    %c0_8 = arith.constant 0 : index
    %22 = vector.load %arg3[%c0_7, %c0_8] : memref<16x128xf32, #tpu.memory_space<vmem>>, vector<16x128xf32>
    tpu.vector_store %arg3[%c0_7, %c0_8], %21 {strides = array<i32>} : memref<16x128xf32, #tpu.memory_space<vmem>>, vector<16x128xf32>,
    return
  }
  func.func @transform_0(%arg0: i32) -> (i32, i32) {
    %c0_i32 = arith.constant 0 : i32
    %c0_i32_0 = arith.constant 0 : i32
    return %arg0, %c0_i32 : i32, i32
  }
  func.func @transform_1(%arg0: i32) -> (i32, i32) {
    %c0_i32 = arith.constant 0 : i32
    %c0_i32_0 = arith.constant 0 : i32
    %c0_i32_1 = arith.constant 0 : i32
    return %c0_i32, %c0_i32_0 : i32, i32
  }
  func.func @transform_2(%arg0: i32) -> (i32, i32) {
    %c0_i32 = arith.constant 0 : i32
    %c0_i32_0 = arith.constant 0 : i32
    return %arg0, %c0_i32 : i32, i32
  }
}

</mosaic_0001>

<bundles_post_ra>
// kernel: self_attention_forward.3
= control target key start
LH: loop header
LB: loop body
LE: loop exit
PB: predicated region body
PF: predicated region fallthrough
CT: control target
= control target key end

     0   :  { %v52_v27 = vlaneseq  ;;  %s179_s1 = inlined_call_operand.vmem [shape: f32[128,128], index: 1, kind: input, shape index: {}]   ;;  %s180_s0 = inlined_call_operand.vmem [shape: f32[16,128], index: 0, kind: input, shape index: {}]   ;;  %s181_s2 = inlined_call_operand.vmem [shape: f32[16,128], index: 2, kind: output, shape index: {}]  }
   0x1   :  { %v27_v0 = vld [vmem:[%s179_s1 + $0x70] sm:$0xff]  ;;  %v28_v1 = vld [vmem:[%s179_s1 + $0x78] sm:$0xff]  ;;  %v25_v3 = vld [vmem:[%s179_s1 + $0x60] sm:$0xff] }
   0x2   :  { %v37_v2 = vpack.c.bf16 %v28_v1, %v27_v0  ;;  %v26_v4 = vld [vmem:[%s179_s1 + $0x68] sm:$0xff]  ;;  %v23_v6 = vld [vmem:[%s179_s1 + $0x50] sm:$0xff]  ;;  %v24_v7 = vld [vmem:[%s179_s1 + $0x58] sm:$0xff]  ;;  %v53_v28 = vand.u32 127, %v52_v27 }
   0x3   :  { %v36_v5 = vpack.c.bf16 %v26_v4, %v25_v3  ;;  %v35_v8 = vpack.c.bf16 %v24_v7, %v23_v6  ;;  %v21_v9 = vld [vmem:[%s179_s1 + $0x40] sm:$0xff]  ;;  %v22_v10 = vld [vmem:[%s179_s1 + $0x48] sm:$0xff]  ;;  %v19_v12 = vld [vmem:[%s179_s1 + $0x30] sm:$0xff] }
   0x4   :  { %38 = vmatpush.bf16.xpose.msra.mxu0 %v37_v2  ;;  %76 = vmatpush.bf16.msra.mxu1 %v37_v2  ;;  %v34_v11 = vpack.c.bf16 %v22_v10, %v21_v9  ;;  %v20_v13 = vld [vmem:[%s179_s1 + $0x38] sm:$0xff]  ;;  %v17_v15 = vld [vmem:[%s179_s1 + $0x20] sm:$0xff]  ;;  %v18_v16 = vld [vmem:[%s179_s1 + $0x28] sm:$0xff]  ;;  %vm54_vm0 = vcmp.lt.s32.totalorder %v53_v28, 48 }
   0x5   :  { %v33_v14 = vpack.c.bf16 %v20_v13, %v19_v12  ;;  %v32_v17 = vpack.c.bf16 %v18_v16, %v17_v15  ;;  %v15_v18 = vld [vmem:[%s179_s1 + $0x10] sm:$0xff]  ;;  %v16_v19 = vld [vmem:[%s179_s1 + $0x18] sm:$0xff]  ;;  %v13_v21 = vld [vmem:[%s179_s1] sm:$0xff] }
   0x6   :  { %v31_v20 = vpack.c.bf16 %v16_v19, %v15_v18  ;;  %v14_v22 = vld [vmem:[%s179_s1 + $0x8] sm:$0xff]  ;;  %v11_v24 = vld [vmem:[%s180_s0] sm:$0xff] }
   0x7   :  { %v30_v23 = vpack.c.bf16 %v14_v22, %v13_v21  ;;  %v12_v25 = vld [vmem:[%s180_s0 + $0x8] sm:$0xff] }
   0x8   :  { %77 = vmatpush.bf16.msra.mxu1 %v36_v5  ;;  %v29_v26 = vpack.c.bf16 %v12_v25, %v11_v24 }
   0xc   :  { %39 = vmatpush.bf16.xpose.msra.mxu0 %v36_v5  ;;  %78 = vmatpush.bf16.msra.mxu1 %v35_v8 }
  0x10   :  { %79 = vmatpush.bf16.msra.mxu1 %v34_v11 }
  0x14   :  { %40 = vmatpush.bf16.xpose.msra.mxu0 %v35_v8  ;;  %80 = vmatpush.bf16.msra.mxu1 %v33_v14 }
  0x18   :  { %81 = vmatpush.bf16.msra.mxu1 %v32_v17 }
  0x1c   :  { %41 = vmatpush.bf16.xpose.msra.mxu0 %v34_v11  ;;  %82 = vmatpush.bf16.msra.mxu1 %v31_v20 }
  0x20   :  { %83 = vmatpush.bf16.msra.mxu1 %v30_v23 }
  0x24   :  { %42 = vmatpush.bf16.xpose.msra.mxu0 %v33_v14 }
  0x2c   :  { %43 = vmatpush.bf16.xpose.msra.mxu0 %v32_v17 }
  0x34   :  { %44 = vmatpush.bf16.xpose.msra.mxu0 %v31_v20 }
  0x3c   :  { %45 = vmatpush.bf16.xpose.msra.mxu0 %v30_v23 }
  0x43   :  { %46 = vmatmul.bf16.vlgmr.msra.gmra.mxu0 %v29_v26 }
  0xc0   :  { %v47_v29 = vpop.f32.mrf.mxu0 }
  0xc1   :  { %v55_v30 = vsel %vm54_vm0, %v47_v29, -inf }
  0xc2   :  { %57 = vmax.xlane.f32.xlu0 %v55_v30 }
  0xc8   :  { %v49_v31 = vpop.f32.mrf.mxu0 }
  0xc9   :  { %v56_v32 = vsel %vm54_vm0, %v49_v31, -inf }
  0xca   :  { %59 = vmax.xlane.f32.xlu0 %v56_v32 }
 0x135   :  { %v58_v33 = vpop.xlane.xlu0 %57 }
 0x136   :  { %v61_v34 = vsub.f32 %v55_v30, %v58_v33 }
 0x138   :  { %v63_v35 = vmul.f32 1.442695, %v61_v34 }
 0x13a   :  { %96 = vpow2.f32 %v63_v35 }
 0x13d   :  { %v60_v36 = vpop.xlane.xlu0 %59 }
 0x13e   :  { %v62_v37 = vsub.f32 %v56_v32, %v60_v36 }
 0x140   :  { %v97_v38 = vpop.eup %96  ;;  %v65_v39 = vmul.f32 1.442695, %v62_v37 }
 0x141   :  { %67 = vadd.xlane.f32.xlu1 %v97_v38 }
 0x142   :  { %98 = vpow2.f32 %v65_v39 }
 0x148   :  { %v99_v40 = vpop.eup %98 }
 0x149   :  { %69 = vadd.xlane.f32.xlu1 %v99_v40 }
 0x1b4   :  { %v68_v41 = vpop.xlane.xlu1 %67 }
 0x1b5   :  { %100 = vrcp.f32 %v68_v41 }
 0x1bb   :  { %v101_v43 = vpop.eup %100 }
 0x1bc   :  { %v70_v42 = vpop.xlane.xlu1 %69  ;;  %v73_v45 = vmul.f32 %v101_v43, %v97_v38 }
 0x1bd   :  { %102 = vrcp.f32 %v70_v42 }
 0x1c3   :  { %v103_v44 = vpop.eup %102 }
 0x1c4   :  { %v74_v46 = vmul.f32 %v103_v44, %v99_v40 }
 0x1c6   :  { %v75_v47 = vpack.c.bf16 %v74_v46, %v73_v45 }
 0x1c8   :  { %84 = vmatmul.bf16.vlgmr.msra.gmra.mxu1 %v75_v47 }
 0x245   :  { %v85_v48 = vpop.f32.mrf.mxu1 }
 0x246   :  { %90 = vst [vmem:[%s181_s2] sm:$0xff] %v85_v48 }
 0x24d   :  { %v87_v49 = vpop.f32.mrf.mxu1 }
 0x24e   :  { %91 = vst [vmem:[%s181_s2 + $0x8] sm:$0xff] %v87_v49 }

// kernel: self_attention_forward.2
= control target key start
LH: loop header
LB: loop body
LE: loop exit
PB: predicated region body
PF: predicated region fallthrough
CT: control target
= control target key end

     0   :  { %v52_v27 = vlaneseq  ;;  %s179_s1 = inlined_call_operand.vmem [shape: f32[128,128], index: 1, kind: input, shape index: {}]   ;;  %s180_s0 = inlined_call_operand.vmem [shape: f32[16,128], index: 0, kind: input, shape index: {}]   ;;  %s181_s2 = inlined_call_operand.vmem [shape: f32[16,128], index: 2, kind: output, shape index: {}]  }
   0x1   :  { %v27_v0 = vld [vmem:[%s179_s1 + $0x70] sm:$0xff]  ;;  %v28_v1 = vld [vmem:[%s179_s1 + $0x78] sm:$0xff]  ;;  %v25_v3 = vld [vmem:[%s179_s1 + $0x60] sm:$0xff] }
   0x2   :  { %v37_v2 = vpack.c.bf16 %v28_v1, %v27_v0  ;;  %v26_v4 = vld [vmem:[%s179_s1 + $0x68] sm:$0xff]  ;;  %v23_v6 = vld [vmem:[%s179_s1 + $0x50] sm:$0xff]  ;;  %v24_v7 = vld [vmem:[%s179_s1 + $0x58] sm:$0xff]  ;;  %v53_v28 = vand.u32 127, %v52_v27 }
   0x3   :  { %v36_v5 = vpack.c.bf16 %v26_v4, %v25_v3  ;;  %v35_v8 = vpack.c.bf16 %v24_v7, %v23_v6  ;;  %v21_v9 = vld [vmem:[%s179_s1 + $0x40] sm:$0xff]  ;;  %v22_v10 = vld [vmem:[%s179_s1 + $0x48] sm:$0xff]  ;;  %v19_v12 = vld [vmem:[%s179_s1 + $0x30] sm:$0xff] }
   0x4   :  { %38 = vmatpush.bf16.xpose.msra.mxu0 %v37_v2  ;;  %76 = vmatpush.bf16.msra.mxu1 %v37_v2  ;;  %v34_v11 = vpack.c.bf16 %v22_v10, %v21_v9  ;;  %v20_v13 = vld [vmem:[%s179_s1 + $0x38] sm:$0xff]  ;;  %v17_v15 = vld [vmem:[%s179_s1 + $0x20] sm:$0xff]  ;;  %v18_v16 = vld [vmem:[%s179_s1 + $0x28] sm:$0xff]  ;;  %vm54_vm0 = vcmp.lt.s32.totalorder %v53_v28, 64 }
   0x5   :  { %v33_v14 = vpack.c.bf16 %v20_v13, %v19_v12  ;;  %v32_v17 = vpack.c.bf16 %v18_v16, %v17_v15  ;;  %v15_v18 = vld [vmem:[%s179_s1 + $0x10] sm:$0xff]  ;;  %v16_v19 = vld [vmem:[%s179_s1 + $0x18] sm:$0xff]  ;;  %v13_v21 = vld [vmem:[%s179_s1] sm:$0xff] }
   0x6   :  { %v31_v20 = vpack.c.bf16 %v16_v19, %v15_v18  ;;  %v14_v22 = vld [vmem:[%s179_s1 + $0x8] sm:$0xff]  ;;  %v11_v24 = vld [vmem:[%s180_s0] sm:$0xff] }
   0x7   :  { %v30_v23 = vpack.c.bf16 %v14_v22, %v13_v21  ;;  %v12_v25 = vld [vmem:[%s180_s0 + $0x8] sm:$0xff] }
   0x8   :  { %77 = vmatpush.bf16.msra.mxu1 %v36_v5  ;;  %v29_v26 = vpack.c.bf16 %v12_v25, %v11_v24 }
   0xc   :  { %39 = vmatpush.bf16.xpose.msra.mxu0 %v36_v5  ;;  %78 = vmatpush.bf16.msra.mxu1 %v35_v8 }
  0x10   :  { %79 = vmatpush.bf16.msra.mxu1 %v34_v11 }
  0x14   :  { %40 = vmatpush.bf16.xpose.msra.mxu0 %v35_v8  ;;  %80 = vmatpush.bf16.msra.mxu1 %v33_v14 }
  0x18   :  { %81 = vmatpush.bf16.msra.mxu1 %v32_v17 }
  0x1c   :  { %41 = vmatpush.bf16.xpose.msra.mxu0 %v34_v11  ;;  %82 = vmatpush.bf16.msra.mxu1 %v31_v20 }
  0x20   :  { %83 = vmatpush.bf16.msra.mxu1 %v30_v23 }
  0x24   :  { %42 = vmatpush.bf16.xpose.msra.mxu0 %v33_v14 }
  0x2c   :  { %43 = vmatpush.bf16.xpose.msra.mxu0 %v32_v17 }
  0x34   :  { %44 = vmatpush.bf16.xpose.msra.mxu0 %v31_v20 }
  0x3c   :  { %45 = vmatpush.bf16.xpose.msra.mxu0 %v30_v23 }
  0x43   :  { %46 = vmatmul.bf16.vlgmr.msra.gmra.mxu0 %v29_v26 }
  0xc0   :  { %v47_v29 = vpop.f32.mrf.mxu0 }
  0xc1   :  { %v55_v30 = vsel %vm54_vm0, %v47_v29, -inf }
  0xc2   :  { %57 = vmax.xlane.f32.xlu0 %v55_v30 }
  0xc8   :  { %v49_v31 = vpop.f32.mrf.mxu0 }
  0xc9   :  { %v56_v32 = vsel %vm54_vm0, %v49_v31, -inf }
  0xca   :  { %59 = vmax.xlane.f32.xlu0 %v56_v32 }
 0x135   :  { %v58_v33 = vpop.xlane.xlu0 %57 }
 0x136   :  { %v61_v34 = vsub.f32 %v55_v30, %v58_v33 }
 0x138   :  { %v63_v35 = vmul.f32 1.442695, %v61_v34 }
 0x13a   :  { %96 = vpow2.f32 %v63_v35 }
 0x13d   :  { %v60_v36 = vpop.xlane.xlu0 %59 }
 0x13e   :  { %v62_v37 = vsub.f32 %v56_v32, %v60_v36 }
 0x140   :  { %v97_v38 = vpop.eup %96  ;;  %v65_v39 = vmul.f32 1.442695, %v62_v37 }
 0x141   :  { %67 = vadd.xlane.f32.xlu1 %v97_v38 }
 0x142   :  { %98 = vpow2.f32 %v65_v39 }
 0x148   :  { %v99_v40 = vpop.eup %98 }
 0x149   :  { %69 = vadd.xlane.f32.xlu1 %v99_v40 }
 0x1b4   :  { %v68_v41 = vpop.xlane.xlu1 %67 }
 0x1b5   :  { %100 = vrcp.f32 %v68_v41 }
 0x1bb   :  { %v101_v43 = vpop.eup %100 }
 0x1bc   :  { %v70_v42 = vpop.xlane.xlu1 %69  ;;  %v73_v45 = vmul.f32 %v101_v43, %v97_v38 }
 0x1bd   :  { %102 = vrcp.f32 %v70_v42 }
 0x1c3   :  { %v103_v44 = vpop.eup %102 }
 0x1c4   :  { %v74_v46 = vmul.f32 %v103_v44, %v99_v40 }
 0x1c6   :  { %v75_v47 = vpack.c.bf16 %v74_v46, %v73_v45 }
 0x1c8   :  { %84 = vmatmul.bf16.vlgmr.msra.gmra.mxu1 %v75_v47 }
 0x245   :  { %v85_v48 = vpop.f32.mrf.mxu1 }
 0x246   :  { %90 = vst [vmem:[%s181_s2] sm:$0xff] %v85_v48 }
 0x24d   :  { %v87_v49 = vpop.f32.mrf.mxu1 }
 0x24e   :  { %91 = vst [vmem:[%s181_s2 + $0x8] sm:$0xff] %v87_v49 }

</bundles_post_ra>
